<compile_context>
chip_gen: v6e
topology: v6e:2x2x1
jax: 0.10.0
libtpu: 0.0.40
codegen_flags: <defaults>
</compile_context>

<pallas_src>
import jax
import jax.numpy as jnp
from jax.experimental import pallas as pl
from jax.experimental.pallas import tpu as pltpu

NUM_CLASSES = 10
PAD_CLASSES = 128  # lane-dense output slab


def mlp_kernel(x_ref, w1_ref, b1_ref, w2_ref, b2_ref, w3_ref, b3_ref, o_ref):
    # hidden_1 + ReLU  (bf16 matmul operands, f32 accumulation & elementwise)
    h1 = jnp.dot(x_ref[...].astype(jnp.bfloat16), w1_ref[...],
                 preferred_element_type=jnp.float32)
    h1 = jnp.maximum(h1 + b1_ref[...], 0.0)
    # hidden_2 + ReLU
    h2 = jnp.dot(h1.astype(jnp.bfloat16), w2_ref[...],
                 preferred_element_type=jnp.float32)
    h2 = jnp.maximum(h2 + b2_ref[...], 0.0)
    # output layer (padded to 128 lanes; padded columns carry a -1e30 bias so
    # they vanish in the softmax sum)
    logits = jnp.dot(h2.astype(jnp.bfloat16), w3_ref[...],
                     preferred_element_type=jnp.float32)
    logits = logits + b3_ref[...]
    # log_softmax over dim=1 (numerically stable)
    m = jnp.max(logits, axis=1, keepdims=True)
    shifted = logits - m
    lse = jnp.log(jnp.sum(jnp.exp(shifted), axis=1, keepdims=True))
    o_ref[...] = shifted - lse


def _round_up(n, m):
    return ((n + m - 1) // m) * m


def network_forward(x, w1, b1, w2, b2, w3, b3, *, block_b=256):
    B, K = x.shape
    assert K == 784

    # Batch tile: up to block_b rows, 8-row aligned; pad B to a tile multiple.
    tb = min(block_b, _round_up(B, 8))
    Bp = _round_up(B, tb)
    if Bp != B:
        x = jnp.pad(x, ((0, Bp - B), (0, 0)))

    # bf16 matmul operands (kernel accumulates in f32).
    w1b = w1.astype(jnp.bfloat16)
    w2b = w2.astype(jnp.bfloat16)
    # Pad output layer to a lane-dense 128-wide slab.
    w3p = jnp.pad(w3, ((0, 0), (0, PAD_CLASSES - NUM_CLASSES))).astype(jnp.bfloat16)
    b3p = jnp.pad(b3, ((0, 0), (0, PAD_CLASSES - NUM_CLASSES)),
                  constant_values=-1e30)

    grid = (Bp // tb,)
    resident = lambda i: (0, 0)  # weights/biases stay in VMEM across the grid

    flops = 2 * Bp * (784 * 128 + 128 * 64 + 64 * PAD_CLASSES)
    bytes_accessed = (
        4 * Bp * 784                                    # x read
        + 2 * (784 * 128 + 128 * 64 + 64 * PAD_CLASSES)  # bf16 weights
        + 4 * (128 + 64 + PAD_CLASSES)                   # f32 biases
        + 4 * Bp * PAD_CLASSES                           # output write
    )

    out = pl.pallas_call(
        mlp_kernel,
        out_shape=jax.ShapeDtypeStruct((Bp, PAD_CLASSES), jnp.float32),
        grid=grid,
        in_specs=[
            pl.BlockSpec((tb, 784), lambda i: (i, 0)),        # x tile
            pl.BlockSpec((784, 128), resident),               # w1
            pl.BlockSpec((1, 128), resident),                 # b1
            pl.BlockSpec((128, 64), resident),                # w2
            pl.BlockSpec((1, 64), resident),                  # b2
            pl.BlockSpec((64, PAD_CLASSES), resident),        # w3 (padded)
            pl.BlockSpec((1, PAD_CLASSES), resident),         # b3 (padded)
        ],
        out_specs=pl.BlockSpec((tb, PAD_CLASSES), lambda i: (i, 0)),
        compiler_params=pltpu.CompilerParams(
            dimension_semantics=("parallel",),
            vmem_limit_bytes=32 << 20,
        ),
        cost_estimate=pl.CostEstimate(
            flops=flops,
            bytes_accessed=bytes_accessed,
            transcendentals=Bp * PAD_CLASSES,
        ),
    )(x, w1b, b1, w2b, b2, w3p, b3p)

    return out[:B, :NUM_CLASSES]


def init_params(key):
    # Deterministic init mimicking nn.Linear's uniform(-1/sqrt(fan_in), 1/sqrt(fan_in))
    ks = jax.random.split(key, 6)

    def lin(kw, kb, fan_in, fan_out):
        bound = 1.0 / jnp.sqrt(jnp.float32(fan_in))
        w = jax.random.uniform(kw, (fan_in, fan_out), jnp.float32, -bound, bound)
        b = jax.random.uniform(kb, (1, fan_out), jnp.float32, -bound, bound)
        return w, b

    w1, b1 = lin(ks[0], ks[1], 784, 128)
    w2, b2 = lin(ks[2], ks[3], 128, 64)
    w3, b3 = lin(ks[4], ks[5], 64, 10)
    return w1, b1, w2, b2, w3, b3


if __name__ == "__main__":
    key = jax.random.PRNGKey(0)
    k_x, k_p = jax.random.split(key)
    B = 8
    x = jax.random.normal(k_x, (B, 784), dtype=jnp.float32)
    params = init_params(k_p)

    out = network_forward(x, *params)
    out = jax.block_until_ready(out)
    assert out.shape == (B, NUM_CLASSES)

    w1, b1, w2, b2, w3, b3 = params

    # Reference 1: mimics the kernel's mixed precision (bf16 matmuls, f32 accum).
    bf = jnp.bfloat16
    h1 = jnp.maximum(jnp.dot(x.astype(bf), w1.astype(bf),
                             preferred_element_type=jnp.float32) + b1, 0.0)
    h2 = jnp.maximum(jnp.dot(h1.astype(bf), w2.astype(bf),
                             preferred_element_type=jnp.float32) + b2, 0.0)
    logits = jnp.dot(h2.astype(bf), w3.astype(bf),
                     preferred_element_type=jnp.float32) + b3
    ref_bf16 = jax.nn.log_softmax(logits, axis=1)
    assert jnp.allclose(out, ref_bf16, atol=5e-3, rtol=5e-3)

    # Reference 2: pure f32 PyTorch-equivalent forward (loose tolerance for bf16).
    h1f = jnp.maximum(x @ w1 + b1, 0.0)
    h2f = jnp.maximum(h1f @ w2 + b2, 0.0)
    ref_f32 = jax.nn.log_softmax(h2f @ w3 + b3, axis=1)
    assert jnp.allclose(out, ref_f32, atol=1e-1, rtol=1e-1)

    print("KERNEL_OK")
</pallas_src>

<mosaic_0001>
module attributes {stable_mosaic.version = 11 : i64} {
  func.func @mlp_kernel(%arg0: i32, %arg1: memref<8x784xf32, #tpu.memory_space<vmem>>, %arg2: memref<784x128xbf16, #tpu.memory_space<vmem>>, %arg3: memref<1x128xf32, #tpu.memory_space<vmem>>, %arg4: memref<128x64xbf16, #tpu.memory_space<vmem>>, %arg5: memref<1x64xf32, #tpu.memory_space<vmem>>, %arg6: memref<64x128xbf16, #tpu.memory_space<vmem>>, %arg7: memref<1x128xf32, #tpu.memory_space<vmem>>, %arg8: memref<8x128xf32, #tpu.memory_space<vmem>>) attributes {dimension_semantics = [#tpu.dimension_semantics<parallel>], iteration_bounds = array<i64: 1>, scalar_prefetch = 0 : i64, scratch_operands = 0 : i64, tpu.core_type = #tpu.core_type<tc>, window_params = [{transform_indices = @transform_0, window_bounds = array<i64: 8, 784>}, {pipeline_mode = #tpu.pipeline_mode<synchronous>, transform_indices = @transform_1, window_bounds = array<i64: 784, 128>}, {pipeline_mode = #tpu.pipeline_mode<synchronous>, transform_indices = @transform_2, window_bounds = array<i64: 1, 128>}, {pipeline_mode = #tpu.pipeline_mode<synchronous>, transform_indices = @transform_3, window_bounds = array<i64: 128, 64>}, {pipeline_mode = #tpu.pipeline_mode<synchronous>, transform_indices = @transform_4, window_bounds = array<i64: 1, 64>}, {pipeline_mode = #tpu.pipeline_mode<synchronous>, transform_indices = @transform_5, window_bounds = array<i64: 64, 128>}, {pipeline_mode = #tpu.pipeline_mode<synchronous>, transform_indices = @transform_6, window_bounds = array<i64: 1, 128>}, {transform_indices = @transform_7, window_bounds = array<i64: 8, 128>}]} {
    %c0 = arith.constant 0 : index
    %c0_0 = arith.constant 0 : index
    %0 = vector.load %arg1[%c0, %c0_0] : memref<8x784xf32, #tpu.memory_space<vmem>>, vector<8x784xf32>
    %1 = arith.truncf %0 : vector<8x784xf32> to vector<8x784xbf16>
    %c0_1 = arith.constant 0 : index
    %c0_2 = arith.constant 0 : index
    %2 = vector.load %arg2[%c0_1, %c0_2] : memref<784x128xbf16, #tpu.memory_space<vmem>>, vector<784x128xbf16>
    %cst = arith.constant dense<0.000000e+00> : vector<8x128xf32>
    %3 = tpu.matmul %1, %2, %cst {dimension_numbers = #tpu.dot_dimension_numbers<[1], [0], [0], [1], [0, 0, 1, 1], [], []>} : vector<8x784xbf16>, vector<784x128xbf16>, vector<8x128xf32> -> vector<8x128xf32>
    %c0_3 = arith.constant 0 : index
    %c0_4 = arith.constant 0 : index
    %4 = vector.load %arg3[%c0_3, %c0_4] : memref<1x128xf32, #tpu.memory_space<vmem>>, vector<1x128xf32>
    %5 = vector.broadcast %4 : vector<1x128xf32> to vector<8x128xf32>
    %6 = arith.addf %3, %5 : vector<8x128xf32>
    %cst_5 = arith.constant 0.000000e+00 : f32
    %7 = vector.broadcast %cst_5 : f32 to vector<8x128xf32>
    %8 = arith.maximumf %6, %7 : vector<8x128xf32>
    %9 = arith.truncf %8 : vector<8x128xf32> to vector<8x128xbf16>
    %c0_6 = arith.constant 0 : index
    %c0_7 = arith.constant 0 : index
    %10 = vector.load %arg4[%c0_6, %c0_7] : memref<128x64xbf16, #tpu.memory_space<vmem>>, vector<128x64xbf16>
    %cst_8 = arith.constant dense<0.000000e+00> : vector<8x64xf32>
    %11 = tpu.matmul %9, %10, %cst_8 {dimension_numbers = #tpu.dot_dimension_numbers<[1], [0], [0], [1], [0, 0, 1, 1], [], []>} : vector<8x128xbf16>, vector<128x64xbf16>, vector<8x64xf32> -> vector<8x64xf32>
    %c0_9 = arith.constant 0 : index
    %c0_10 = arith.constant 0 : index
    %12 = vector.load %arg5[%c0_9, %c0_10] : memref<1x64xf32, #tpu.memory_space<vmem>>, vector<1x64xf32>
    %13 = vector.broadcast %12 : vector<1x64xf32> to vector<8x64xf32>
    %14 = arith.addf %11, %13 : vector<8x64xf32>
    %cst_11 = arith.constant 0.000000e+00 : f32
    %15 = vector.broadcast %cst_11 : f32 to vector<8x64xf32>
    %16 = arith.maximumf %14, %15 : vector<8x64xf32>
    %17 = arith.truncf %16 : vector<8x64xf32> to vector<8x64xbf16>
    %c0_12 = arith.constant 0 : index
    %c0_13 = arith.constant 0 : index
    %18 = vector.load %arg6[%c0_12, %c0_13] : memref<64x128xbf16, #tpu.memory_space<vmem>>, vector<64x128xbf16>
    %cst_14 = arith.constant dense<0.000000e+00> : vector<8x128xf32>
    %19 = tpu.matmul %17, %18, %cst_14 {dimension_numbers = #tpu.dot_dimension_numbers<[1], [0], [0], [1], [0, 0, 1, 1], [], []>} : vector<8x64xbf16>, vector<64x128xbf16>, vector<8x128xf32> -> vector<8x128xf32>
    %c0_15 = arith.constant 0 : index
    %c0_16 = arith.constant 0 : index
    %20 = vector.load %arg7[%c0_15, %c0_16] : memref<1x128xf32, #tpu.memory_space<vmem>>, vector<1x128xf32>
    %21 = vector.broadcast %20 : vector<1x128xf32> to vector<8x128xf32>
    %22 = arith.addf %19, %21 : vector<8x128xf32>
    %cst_17 = arith.constant dense<0xFF800000> : vector<8xf32>
    %23 = vector.multi_reduction <maximumf>, %22, %cst_17 [1] : vector<8x128xf32> to vector<8xf32>
    %24 = vector.shape_cast %23 : vector<8xf32> to vector<8x1xf32>
    %25 = vector.broadcast %24 : vector<8x1xf32> to vector<8x128xf32>
    %26 = arith.subf %22, %25 : vector<8x128xf32>
    %27 = math.exp %26 : vector<8x128xf32>
    %cst_18 = arith.constant dense<0.000000e+00> : vector<8xf32>
    %28 = vector.multi_reduction <add>, %27, %cst_18 [1] : vector<8x128xf32> to vector<8xf32>
    %29 = vector.shape_cast %28 : vector<8xf32> to vector<8x1xf32>
    %30 = math.log %29 : vector<8x1xf32>
    %31 = vector.broadcast %30 : vector<8x1xf32> to vector<8x128xf32>
    %32 = arith.subf %26, %31 : vector<8x128xf32>
    %c0_19 = arith.constant 0 : index
    %c0_20 = arith.constant 0 : index
    %33 = vector.load %arg8[%c0_19, %c0_20] : memref<8x128xf32, #tpu.memory_space<vmem>>, vector<8x128xf32>
    tpu.vector_store %arg8[%c0_19, %c0_20], %32 {strides = array<i32>} : memref<8x128xf32, #tpu.memory_space<vmem>>, vector<8x128xf32>,
    return
  }
  func.func @transform_0(%arg0: i32) -> (i32, i32) {
    %c0_i32 = arith.constant 0 : i32
    %c0_i32_0 = arith.constant 0 : i32
    return %arg0, %c0_i32 : i32, i32
  }
  func.func @transform_1(%arg0: i32) -> (i32, i32) {
    %c0_i32 = arith.constant 0 : i32
    %c0_i32_0 = arith.constant 0 : i32
    %c0_i32_1 = arith.constant 0 : i32
    return %c0_i32, %c0_i32_0 : i32, i32
  }
  func.func @transform_2(%arg0: i32) -> (i32, i32) {
    %c0_i32 = arith.constant 0 : i32
    %c0_i32_0 = arith.constant 0 : i32
    %c0_i32_1 = arith.constant 0 : i32
    return %c0_i32, %c0_i32_0 : i32, i32
  }
  func.func @transform_3(%arg0: i32) -> (i32, i32) {
    %c0_i32 = arith.constant 0 : i32
    %c0_i32_0 = arith.constant 0 : i32
    %c0_i32_1 = arith.constant 0 : i32
    return %c0_i32, %c0_i32_0 : i32, i32
  }
  func.func @transform_4(%arg0: i32) -> (i32, i32) {
    %c0_i32 = arith.constant 0 : i32
    %c0_i32_0 = arith.constant 0 : i32
    %c0_i32_1 = arith.constant 0 : i32
    return %c0_i32, %c0_i32_0 : i32, i32
  }
  func.func @transform_5(%arg0: i32) -> (i32, i32) {
    %c0_i32 = arith.constant 0 : i32
    %c0_i32_0 = arith.constant 0 : i32
    %c0_i32_1 = arith.constant 0 : i32
    return %c0_i32, %c0_i32_0 : i32, i32
  }
  func.func @transform_6(%arg0: i32) -> (i32, i32) {
    %c0_i32 = arith.constant 0 : i32
    %c0_i32_0 = arith.constant 0 : i32
    %c0_i32_1 = arith.constant 0 : i32
    return %c0_i32, %c0_i32_0 : i32, i32
  }
  func.func @transform_7(%arg0: i32) -> (i32, i32) {
    %c0_i32 = arith.constant 0 : i32
    %c0_i32_0 = arith.constant 0 : i32
    return %arg0, %c0_i32 : i32, i32
  }
}

</mosaic_0001>

<bundles_post_ra>
// kernel: tpu_custom_call.1
= control target key start
LH: loop header
LB: loop body
LE: loop exit
PB: predicated region body
PF: predicated region fallthrough
CT: control target
= control target key end

     0   :  { %12 = vsyncpa [#allocation3], 0  ;;  %s1281_s0 = inlined_call_operand.vmem [shape: f32[8,784], index: 0, kind: input, shape index: {}]   ;;  %s1282_s1 = inlined_call_operand.hbm [shape: bf16[784,128], index: 1, kind: input, shape index: {}]   ;;  %s1283_s2 = inlined_call_operand.vmem [shape: f32[1,128], index: 2, kind: input, shape index: {}]   ;;  %s1284_s3 = inlined_call_operand.vmem [shape: bf16[128,64], index: 3, kind: input, shape index: {}]   ;;  %s1285_s4 = inlined_call_operand.vmem [shape: f32[1,64], index: 4, kind: input, shape index: {}]   ;;  %s1286_s5 = inlined_call_operand.vmem [shape: bf16[64,128], index: 5, kind: input, shape index: {}]   ;;  %s1287_s6 = inlined_call_operand.vmem [shape: f32[1,128], index: 6, kind: input, shape index: {}]   ;;  %s1288_s7 = inlined_call_operand.hbm [shape: f32[8,128], index: 7, kind: output, shape index: {}]  }
   0x1   :  { %13 = vsyncpa [#allocation4], 0  ;;  %s1144_s24 = smov [#allocation2]  }
   0x2   :  { %s21_s25 = sshll.u32 %s1144_s24, 4  ;;  %s22_s25 = int_to_ptr.vmem [resolvable:$true] %s21_s25 }
   0x3   :  { %s1108_s26 = scalar_lea.vmem %s22_s25, 6272  ;;  %p1113_p1 = scmp.lt.s32.totalorder %s22_s25, %s22_s25 }
   0x4   :  { %p1109_p0 = scmp.ne.s32.totalorder %s22_s25, %s1108_s26  ;;  %p1114_p2 = scmp.lt.s32.totalorder %s1108_s26, %s1108_s26 }
   0x6   :  { %p1115_p3 = por %p1114_p2, %p1113_p1 }
   0x8   :  { %p1116_p4 = pnand %p1115_p3, %p1109_p0 }
   0xa   :  { %1119 = shalt.err (!%p1116_p4)
}
   0xb   :  { %s1145_s27 = smov 64   ;;  %s1146_s28 = smov 4  }
   0xc   :  { %27 = dma.hbm_to_vmem [thread:$0]  %s1282_s1, 6272, %s22_s25, [#allocation3], %s1145_s27, %s1145_s27, %s1146_s28  }
   0xd   :  { %1140 = dma.done.wait [#allocation3], 6272  }
   0xe   :  { %1141 = vsyncadd [#allocation3], 4294961024  ;;  %v1035_v0 = vld [vmem:[#allocation2 + $0x78] sm:$0xff]   ;;  %v1039_v4 = vld [vmem:[#allocation2 + $0x70] sm:$0xff]   ;;  %v1147_v44 = vmov 0.0   ;;  %vm1148_vm0 = vmmov 0  }
   0xf   :  { %v1036_v1 = vld [vmem:[#allocation2 + $0x38] sm:$0xff]   ;;  %909 = vmatprep.subr.bf16.mxu0 %v1035_v0  ;;  %v1040_v5 = vld [vmem:[#allocation2 + $0x30] sm:$0xff]   ;;  %v1043_v8 = vld [vmem:[#allocation2 + $0x68] sm:$0xff]   ;;  %vm455_vm1 = vcmask 130048   ;;  %vm773_vm2 = vcmask 523264  }
  0x10   :  { %v1037_v2 = vld [vmem:[#allocation2 + $0xf8] sm:$0xff]   ;;  %910 = vmatpush3.bf16.msra.mxu0 %v1036_v1  ;;  %v1041_v6 = vld [vmem:[#allocation2 + $0xf0] sm:$0xff]   ;;  %v1044_v9 = vld [vmem:[#allocation2 + $0x28] sm:$0xff]  }
  0x11   :  { %v1038_v3 = vld [vmem:[#allocation2 + $0xb8] sm:$0xff]   ;;  %931 = vmatprep.subr.bf16.mxu1 %v1037_v2  ;;  %911 = vmatprep.subr.bf16.mxu0 %v1039_v4  ;;  %v1042_v7 = vld [vmem:[#allocation2 + $0xb0] sm:$0xff]   ;;  %v1045_v10 = vld [vmem:[#allocation2 + $0xe8] sm:$0xff]  }
  0x12   :  { %932 = vmatpush3.bf16.msra.mxu1 %v1038_v3  ;;  %v1046_v11 = vld [vmem:[#allocation2 + $0xa8] sm:$0xff]   ;;  %v1047_v12 = vld [vmem:[#allocation2 + $0x60] sm:$0xff]   ;;  %v1051_v16 = vld [vmem:[#allocation2 + $0x58] sm:$0xff]  }
  0x13   :  { %933 = vmatprep.subr.bf16.mxu1 %v1041_v6  ;;  %v1048_v13 = vld [vmem:[#allocation2 + $0x20] sm:$0xff]   ;;  %v1052_v17 = vld [vmem:[#allocation2 + $0x18] sm:$0xff]   ;;  %v1055_v20 = vld [vmem:[#allocation2 + $0x50] sm:$0xff]  }
  0x14   :  { %912 = vmatpush3.bf16.msra.mxu0 %v1040_v5  ;;  %v1049_v14 = vld [vmem:[#allocation2 + $0xe0] sm:$0xff]   ;;  %v1053_v18 = vld [vmem:[#allocation2 + $0xd8] sm:$0xff]   ;;  %v1056_v21 = vld [vmem:[#allocation2 + $0x10] sm:$0xff]  }
  0x15   :  { %913 = vmatprep.subr.bf16.mxu0 %v1043_v8  ;;  %v1050_v15 = vld [vmem:[#allocation2 + $0xa0] sm:$0xff]   ;;  %v1054_v19 = vld [vmem:[#allocation2 + $0x98] sm:$0xff]   ;;  %v1057_v22 = vld [vmem:[#allocation2 + $0xd0] sm:$0xff]  }
  0x16   :  { %934 = vmatpush3.bf16.msra.mxu1 %v1042_v7  ;;  %v1058_v23 = vld [vmem:[#allocation2 + $0x90] sm:$0xff]   ;;  %v1059_v24 = vld [vmem:[#allocation2 + $0x48] sm:$0xff]   ;;  %v1063_v28 = vld [vmem:[#allocation2 + $0x40] sm:$0xff]  }
  0x17   :  { %935 = vmatprep.subr.bf16.mxu1 %v1045_v10  ;;  %v1060_v25 = vld [vmem:[#allocation2 + $0x8] sm:$0xff]   ;;  %v1064_v29 = vld [vmem:[#allocation2] sm:$0xff]   ;;  %v1067_v36 = vld [vmem:[#allocation2 + $0x178] sm:$0xff]  }
  0x18   :  { %914 = vmatpush3.bf16.msra.mxu0 %v1044_v9  ;;  %v1061_v26 = vld [vmem:[#allocation2 + $0xc8] sm:$0xff]   ;;  %v1065_v30 = vld [vmem:[#allocation2 + $0xc0] sm:$0xff]   ;;  %v45_v37 = vld [vmem:[%s1281_s0 + $0x18] sm:$0xff] }
  0x19   :  { %915 = vmatprep.subr.bf16.mxu0 %v1047_v12  ;;  %v1062_v27 = vld [vmem:[#allocation2 + $0x88] sm:$0xff]   ;;  %v1066_v33 = vld [vmem:[#allocation2 + $0x80] sm:$0xff]   ;;  %v52_v38 = vpack.c.bf16 %v45_v37, %v45_v37  ;;  %v1068_v39 = vld [vmem:[#allocation2 + $0x138] sm:$0xff]  }
  0x1a   :  { %936 = vmatpush3.bf16.msra.mxu1 %v1046_v11  ;;  %v43_v31 = vld [vmem:[%s1281_s0 + $0x8] sm:$0xff]  ;;  %v42_v34 = vld [vmem:[%s1281_s0] sm:$0xff]  ;;  %v44_v40 = vld [vmem:[%s1281_s0 + $0x10] sm:$0xff] }
  0x1b   :  { %937 = vmatprep.subr.bf16.mxu1 %v1049_v14  ;;  %v50_v32 = vpack.c.bf16 %v43_v31, %v43_v31  ;;  %v49_v35 = vpack.c.bf16 %v42_v34, %v42_v34  ;;  %531 = vmatprep.mubr.bf16.mxu1 %v52_v38  ;;  %v51_v41 = vpack.c.bf16 %v44_v40, %v44_v40  ;;  %v1069_v42 = vld [vmem:[#allocation2 + $0x170] sm:$0xff]   ;;  %v1071_v45 = vld [vmem:[#allocation2 + $0x168] sm:$0xff]   ;;  %v1073_v47 = vld [vmem:[#allocation2 + $0x160] sm:$0xff]  }
  0x1c   :  { %916 = vmatpush3.bf16.msra.mxu0 %v1048_v13  ;;  %v1070_v43 = vld [vmem:[#allocation2 + $0x130] sm:$0xff]   ;;  %v1072_v46 = vld [vmem:[#allocation2 + $0x128] sm:$0xff]   ;;  %v1074_v48 = vld [vmem:[#allocation2 + $0x120] sm:$0xff]  }
  0x1d   :  { %917 = vmatprep.subr.bf16.mxu0 %v1051_v16  ;;  %491 = vmatprep.mubr.bf16.mxu0 %v50_v32  ;;  %v1075_v49 = vld [vmem:[#allocation2 + $0x158] sm:$0xff]   ;;  %v1077_v51 = vld [vmem:[#allocation2 + $0x150] sm:$0xff]   ;;  %v1083_v53 = vld [vmem:[#allocation2 + $0x180] sm:$0xff]  }
  0x1e   :  { %938 = vmatpush3.bf16.msra.mxu1 %v1050_v15  ;;  %v1076_v50 = vld [vmem:[#allocation2 + $0x118] sm:$0xff]   ;;  %v1078_v52 = vld [vmem:[#allocation2 + $0x110] sm:$0xff]   ;;  %v47_v54 = vld [vmem:[%s1281_s0 + $0x28] sm:$0xff] }
  0x1f   :  { %939 = vmatprep.subr.bf16.mxu1 %v1053_v18  ;;  %v1079_v55 = vld [vmem:[#allocation2 + $0x148] sm:$0xff]   ;;  %v54_v56 = vpack.c.bf16 %v47_v54, %v47_v54  ;;  %v48_v57 = vld [vmem:[%s1281_s0 + $0x30] sm:$0xff]  ;;  %v1081_v60 = vld [vmem:[#allocation2 + $0x140] sm:$0xff]  }
  0x20   :  { %918 = vmatpush3.bf16.msra.mxu0 %v1052_v17  ;;  %v55_v58 = vpack.c.bf16 %v48_v57, %v48_v57  ;;  %v1080_v59 = vld [vmem:[#allocation2 + $0x108] sm:$0xff]   ;;  %v1082_v61 = vld [vmem:[#allocation2 + $0x100] sm:$0xff]   ;;  %v1084_v0 = vld [vmem:[%s1284_s3 + $0x38] sm:$0xff]  }
  0x21   :  { %919 = vmatprep.subr.bf16.mxu0 %v1055_v20  ;;  %v46_v62 = vld [vmem:[%s1281_s0 + $0x20] sm:$0xff]  ;;  %v1085_v1 = vld [vmem:[%s1284_s3 + $0x30] sm:$0xff]   ;;  %v1086_v2 = vld [vmem:[%s1284_s3 + $0x28] sm:$0xff]  }
  0x22   :  { %940 = vmatpush3.bf16.msra.mxu1 %v1054_v19  ;;  %v53_v63 = vpack.c.bf16 %v46_v62, %v46_v62  ;;  %v1087_v3 = vld [vmem:[%s1284_s3 + $0x20] sm:$0xff]   ;;  %v1088_v4 = vld [vmem:[%s1284_s3 + $0x18] sm:$0xff]   ;;  %v1089_v5 = vld [vmem:[%s1284_s3 + $0x10] sm:$0xff]  }
  0x23   :  { %941 = vmatprep.subr.bf16.mxu1 %v1057_v22  ;;  %v1090_v6 = vld [vmem:[%s1284_s3 + $0x8] sm:$0xff]   ;;  %v1091_v7 = vld [vmem:[%s1284_s3] sm:$0xff]   ;;  %v1092_v8 = vld [vmem:[%s1286_s5 + $0x18] sm:$0xff]  }
  0x24   :  { %920 = vmatpush3.bf16.msra.mxu0 %v1056_v21  ;;  %v1093_v9 = vld [vmem:[%s1286_s5 + $0x10] sm:$0xff]   ;;  %v1095_v37 = vld [vmem:[%s1286_s5] sm:$0xff]  }
  0x25   :  { %921 = vmatprep.subr.bf16.mxu0 %v1059_v24  ;;  %v894_v38 = vld [vmem:[%s1285_s4] ss:$0 sm:$0xff]  ;;  %s1149_s4 = smov [#allocation5]  }
  0x26   :  { %942 = vmatpush3.bf16.msra.mxu1 %v1058_v23  ;;  %v843_v23 = vld [vmem:[%s1283_s2] ss:$0 sm:$0xff] }
  0x27   :  { %943 = vmatprep.subr.bf16.mxu1 %v1061_v26 }
  0x28   :  { %922 = vmatpush3.bf16.msra.mxu0 %v1060_v25 }
  0x29   :  { %923 = vmatprep.subr.bf16.mxu0 %v1063_v28 }
  0x2a   :  { %944 = vmatpush3.bf16.msra.mxu1 %v1062_v27 }
  0x2b   :  { %945 = vmatprep.subr.bf16.mxu1 %v1065_v30 }
  0x2c   :  { %924 = vmatpush3.bf16.msra.mxu0 %v1064_v29 }
  0x2d   :  { %953 = vmatprep.subr.bf16.mxu0 %v1067_v36  ;;  %v1094_v36 = vld [vmem:[%s1286_s5 + $0x8] sm:$0xff]   ;;  %s834_s5 = sshll.u32 %s1149_s4, 4  ;;  %s835_s5 = int_to_ptr.vmem [resolvable:$true] %s834_s5 }
  0x2e   :  { %946 = vmatpush3.bf16.msra.mxu1 %v1066_v33  ;;  %p1125_p6 = scmp.lt.s32.totalorder %s835_s5, %s835_s5 }
  0x2f   :  { %492 = vmatmul.mubr.bf16.vlgmr.msra.gmra.mxu0 %v49_v35  ;;  %991 = vmatprep.subr.bf16.mxu1 %v1147_v44 }
  0x30   :  { %954 = vmatpush3.bf16.msra.mxu0 %v1068_v39  ;;  %571 = vmatprep.mubr.bf16.mxu0 %v54_v56 }
  0x31   :  { %532 = vmatmul.mubr.bf16.vlgmr.msra.gmra.mxu1 %v51_v41  ;;  %955 = vmatprep.subr.bf16.mxu0 %v1069_v42 }
  0x32   :  { %993 = vmatprep.mubr.msk.bf16.mxu1 %vm1148_vm0, %v1147_v44  ;;  %992 = vmatpush3.bf16.msra.mxu1 %v1083_v53 }
  0x33   :  { %997 = vmatprep.subr.bf16.mxu1 %v1147_v44 }
  0x34   :  { %956 = vmatpush3.bf16.msra.mxu0 %v1070_v43 }
  0x35   :  { %957 = vmatprep.subr.bf16.mxu0 %v1071_v45 }
  0x38   :  { %958 = vmatpush3.bf16.msra.mxu0 %v1072_v46 }
  0x39   :  { %959 = vmatprep.subr.bf16.mxu0 %v1073_v47  ;;  %994 = vmatmul.mubr.msk.bf16.vlgmr.msra.gmra.mxu1 %vm455_vm1, %v55_v58 }
  0x3a   :  { %1013 = vmatprep.mubr.msk.bf16.mxu1 %vm1148_vm0, %v1147_v44  ;;  %998 = vmatpush3.bf16.msra.mxu1 %v1084_v0 }
  0x3b   :  { %999 = vmatprep.subr.bf16.mxu1 %v1147_v44 }
  0x3c   :  { %960 = vmatpush3.bf16.msra.mxu0 %v1074_v48 }
  0x3d   :  { %961 = vmatprep.subr.bf16.mxu0 %v1075_v49 }
  0x3e   :  { %1000 = vmatpush3.bf16.msra.mxu1 %v1085_v1 }
  0x3f   :  { %1001 = vmatprep.subr.bf16.mxu1 %v1147_v44 }
  0x40   :  { %962 = vmatpush3.bf16.msra.mxu0 %v1076_v50 }
  0x41   :  { %963 = vmatprep.subr.bf16.mxu0 %v1077_v51 }
  0x42   :  { %1002 = vmatpush3.bf16.msra.mxu1 %v1086_v2 }
  0x43   :  { %1003 = vmatprep.subr.bf16.mxu1 %v1147_v44 }
  0x44   :  { %964 = vmatpush3.bf16.msra.mxu0 %v1078_v52 }
  0x45   :  { %965 = vmatprep.subr.bf16.mxu0 %v1079_v55 }
  0x46   :  { %1004 = vmatpush3.bf16.msra.mxu1 %v1087_v3 }
  0x47   :  { %1005 = vmatprep.subr.bf16.mxu1 %v1147_v44 }
  0x48   :  { %966 = vmatpush3.bf16.msra.mxu0 %v1080_v59 }
  0x49   :  { %967 = vmatprep.subr.bf16.mxu0 %v1081_v60 }
  0x4a   :  { %1006 = vmatpush3.bf16.msra.mxu1 %v1088_v4 }
  0x4b   :  { %1007 = vmatprep.subr.bf16.mxu1 %v1147_v44 }
  0x4c   :  { %968 = vmatpush3.bf16.msra.mxu0 %v1082_v61 }
  0x4d   :  { %1017 = vmatprep.subr.bf16.mxu0 %v1147_v44 }
  0x4e   :  { %1008 = vmatpush3.bf16.msra.mxu1 %v1089_v5 }
  0x4f   :  { %572 = vmatmul.mubr.bf16.vlgmr.msra.gmra.mxu0 %v53_v63  ;;  %1009 = vmatprep.subr.bf16.mxu1 %v1147_v44 }
  0x50   :  { %1025 = vmatprep.mubr.msk.bf16.mxu0 %vm1148_vm0, %v1147_v44  ;;  %1018 = vmatpush3.bf16.msra.mxu0 %v1092_v8 }
  0x51   :  { %1019 = vmatprep.subr.bf16.mxu0 %v1147_v44 }
  0x52   :  { %1010 = vmatpush3.bf16.msra.mxu1 %v1090_v6 }
  0x53   :  { %1011 = vmatprep.subr.bf16.mxu1 %v1147_v44 }
  0x54   :  { %1020 = vmatpush3.bf16.msra.mxu0 %v1093_v9 }
  0x55   :  { %1021 = vmatprep.subr.bf16.mxu0 %v1147_v44 }
  0x56   :  { %1012 = vmatpush3.bf16.msra.mxu1 %v1091_v7 }
  0x58   :  { %1022 = vmatpush3.bf16.msra.mxu0 %v1094_v36 }
  0x59   :  { %1023 = vmatprep.subr.bf16.mxu0 %v1147_v44  ;;  %v903_v44 = vld [vmem:[%s1287_s6] ss:$0 sm:$0xff]  ;;  %s1120_s6 = scalar_lea.vmem %s835_s5, 128 }
  0x5a   :  { %p1121_p5 = scmp.ne.s32.totalorder %s835_s5, %s1120_s6  ;;  %p1126_p7 = scmp.lt.s32.totalorder %s1120_s6, %s1120_s6 }
  0x5c   :  { %1024 = vmatpush3.bf16.msra.mxu0 %v1095_v37  ;;  %p1127_p8 = por %p1126_p7, %p1125_p6 }
  0x5e   :  { %p1128_p9 = pnand %p1127_p8, %p1121_p5 }
  0xef   :  { %v925_v10 = vpop.f32.mrf.mxu0 }
  0xf1   :  { %v926_v11 = vpop.f32.mrf.mxu0  ;;  %v947_v12 = vpop.f32.mrf.mxu1 }
  0xf2   :  { %v927_v22 = vadd.f32 %v926_v11, %v925_v10 }
  0xf3   :  { %v928_v13 = vpop.f32.mrf.mxu0  ;;  %v948_v14 = vpop.f32.mrf.mxu1 }
  0xf4   :  { %v494_v24 = vadd.f32 %v927_v22, %v843_v23  ;;  %v949_v25 = vadd.f32 %v948_v14, %v947_v12 }
  0xf5   :  { %v929_v15 = vpop.f32.mrf.mxu0  ;;  %v950_v16 = vpop.f32.mrf.mxu1 }
  0xf6   :  { %v534_v28 = vadd.f32 %v949_v25, %v494_v24 }
  0xf7   :  { %v951_v17 = vpop.f32.mrf.mxu1 }
  0xf9   :  { %v613_v18 = vpop.f32.mrf.mxu1 }
  0xfb   :  { %v995_v19 = vpop.f32.mrf.mxu1 }
  0xfd   :  { %v616_v20 = vpop.f32.mrf.mxu1 }
  0xff   :  { %v996_v21 = vpop.f32.mrf.mxu1 }
 0x10f   :  { %v969_v26 = vpop.f32.mrf.mxu0 }
 0x111   :  { %v970_v27 = vpop.f32.mrf.mxu0 }
 0x112   :  { %v971_v29 = vadd.f32 %v970_v27, %v969_v26 }
 0x113   :  { %v972_v30 = vpop.f32.mrf.mxu0 }
 0x114   :  { %v574_v31 = vadd.f32 %v971_v29, %v534_v28 }
 0x115   :  { %v973_v32 = vpop.f32.mrf.mxu0 }
 0x116   :  { %v614_v33 = vadd.f32 %v613_v18, %v574_v31 }
 0x118   :  { %v619_v34 = vmax.f32 %v614_v33, 0.0 }
 0x11a   :  { %v620_v35 = vpack.c.bf16 %v619_v34, %v619_v34 }
 0x11c   :  { %1014 = vmatmul.mubr.bf16.vlgmr.msra.gmra.mxu1 %v620_v35 }
 0x1dc   :  { %v726_v39 = vpop.f32.mrf.mxu1 }
 0x1dd   :  { %v727_v40 = vadd.f32 %v894_v38, %v726_v39 }
 0x1de   :  { %v1015_v41 = vpop.f32.mrf.mxu1 }
 0x1df   :  { %v732_v42 = vmax.f32 %v727_v40, 0.0 }
 0x1e0   :  { %v729_v43 = vpop.f32.mrf.mxu1 }
 0x1e1   :  { %v733_v45 = vpack.c.bf16 %v732_v42, %v732_v42 }
 0x1e2   :  { %v1016_v46 = vpop.f32.mrf.mxu1 }
 0x1e3   :  { %1026 = vmatmul.mubr.msk.bf16.vlgmr.msra.gmra.mxu0 %vm773_vm2, %v733_v45 }
 0x2a3   :  { %v811_v47 = vpop.f32.mrf.mxu0 }
 0x2a4   :  { %v812_v48 = vadd.f32 %v903_v44, %v811_v47 }
 0x2a5   :  { %v1027_v49 = vpop.f32.mrf.mxu0 }
 0x2a6   :  { %817 = vmax.xlane.f32.xlu0 %v812_v48 }
 0x2a7   :  { %v814_v50 = vpop.f32.mrf.mxu0 }
 0x2a9   :  { %v1028_v51 = vpop.f32.mrf.mxu0 }
 0x32f   :  { %v818_v52 = vpop.xlane.xlu0 %817 }
 0x330   :  { %v819_v53 = vsub.f32 %v812_v48, %v818_v52 }
 0x332   :  { %v820_v54 = vmul.f32 1.442695, %v819_v53 }
 0x334   :  { %1096 = vpow2.f32 %v820_v54 }
 0x341   :  { %v1097_v55 = vpop.eup %1096 }
 0x342   :  { %822 = vadd.xlane.f32.xlu0 %v1097_v55 }
 0x3cb   :  { %v823_v56 = vpop.xlane.xlu0 %822 }
 0x3cc   :  { %1098 = vlog2.f32 %v823_v56 }
 0x3d9   :  { %v1099_v57 = vpop.eup %1098 }
 0x3da   :  { %v825_v58 = vmul.f32 0.6931472, %v1099_v57 }
 0x3dc   :  { %v826_v59 = vsub.f32 %v819_v53, %v825_v58 }
 0x3de   :  { %827 = vst [vmem:[#allocation5] sm:$0xff] %v826_v59 }
 0x3df   :  { %1131 = shalt.err (!%p1128_p9)
}
 0x3e0   :  { %837 = dma.vmem_to_hbm [thread:$0]  %s835_s5, 128, %s1288_s7, [#allocation4]  }
 0x3e1   :  { %1142 = dma.done.wait [#allocation4], 128  }
 0x3e2   :  { %1143 = vsyncadd [#allocation4], 4294967168 }
 0x3e3   :  { %841 = vsyncpa [#allocation3], 1 }
 0x3e4   :  { %842 = vsyncpa [#allocation4], 1 }

</bundles_post_ra>
